<compile_context>
chip_gen: v6e
topology: v6e:2x2x1
jax: 0.10.0
libtpu: 0.0.40
codegen_flags: <defaults>
</compile_context>

<pallas_src>
import math

import jax
import jax.numpy as jnp
import numpy as np
from jax import lax
from jax.experimental import pallas as pl
from jax.experimental.pallas import tpu as pltpu


def _make_kernel(bt, num_heads, head_dim, ln_eps, with_probs):
    H = num_heads * head_dim
    inv_sqrt_d = 1.0 / math.sqrt(head_dim)

    def kernel(*refs):
        (x_ref, mask_ref,
         wq_ref, bq_ref, wk_ref, bk_ref, wv_ref, bv_ref,
         wo_ref, bo_ref, g_ref, beta_ref) = refs[:12]
        if with_probs:
            out_ref, probs_ref = refs[12:14]
        else:
            out_ref = refs[12]
            probs_ref = None

        _, S, D = x_ref.shape
        Sk = mask_ref.shape[2]

        x = x_ref[...].astype(jnp.float32)            # (Bt, S, D), f32 for residual/LN
        x2 = x.reshape(bt * S, D)
        xb = x2.astype(jnp.bfloat16)

        # Q/K/V projections: one (Bt*S, D) x (D, H) bf16 matmul each, f32 accumulate.
        # 1/sqrt(dh) folded into Q once.
        q = (jnp.dot(xb, wq_ref[...], preferred_element_type=jnp.float32)
             + bq_ref[...]) * inv_sqrt_d
        k = jnp.dot(xb, wk_ref[...], preferred_element_type=jnp.float32) + bk_ref[...]
        v = jnp.dot(xb, wv_ref[...], preferred_element_type=jnp.float32) + bv_ref[...]

        q3 = q.reshape(bt, S, H).astype(jnp.bfloat16)
        k3 = k.reshape(bt, S, H).astype(jnp.bfloat16)
        v3 = v.reshape(bt, S, H).astype(jnp.bfloat16)

        ctx_rows = []
        for b in range(bt):
            mask_b = jnp.broadcast_to(mask_ref[b], (S, Sk)).astype(jnp.float32)
            qb, kb, vb = q3[b], k3[b], v3[b]          # (S, H) bf16
            ctx_heads = []
            probs_heads = []
            for h in range(num_heads):
                lo = h * head_dim
                qh = qb[:, lo:lo + head_dim]
                kh = kb[:, lo:lo + head_dim]
                vh = vb[:, lo:lo + head_dim]

                # q @ k^T without materializing a transpose.
                scores = lax.dot_general(qh, kh, (((1,), (1,)), ((), ())),
                                         preferred_element_type=jnp.float32)  # (S, Sk)
                scores = scores + mask_b

                # Numerically-stable softmax in f32.
                m = jnp.max(scores, axis=-1, keepdims=True)
                e = jnp.exp(scores - m)
                denom = jnp.sum(e, axis=-1, keepdims=True)
                # Exact reciprocal when probs are returned (they must sum to 1);
                # EUP approx reciprocal otherwise.
                p = e * pl.reciprocal(denom, approx=not with_probs)

                # TODO(synk): attention-prob dropout (eval-mode identity).
                ctx_heads.append(jnp.dot(p.astype(jnp.bfloat16), vh,
                                         preferred_element_type=jnp.float32))
                if probs_ref is not None:
                    probs_heads.append(p[None])

            ctx_rows.append(jnp.concatenate(ctx_heads, axis=-1))       # (S, H) in vregs
            if probs_ref is not None:
                # One store per batch element (all heads at once).
                probs_ref[b] = jnp.concatenate(
                    probs_heads, axis=0).astype(probs_ref.dtype)

        # Merged-head context (no VMEM scratch round trip) -> output dense over the
        # full contraction -> residual -> LayerNorm -> ONE lane-dense (Bt,S,D) store.
        ctx = jnp.concatenate(ctx_rows, axis=0).astype(jnp.bfloat16)    # (Bt*S, H)
        attn = jnp.dot(ctx, wo_ref[...],
                       preferred_element_type=jnp.float32) + bo_ref[...]  # (Bt*S, D)
        # TODO(synk): hidden dropout (eval-mode identity).
        y = attn + x2
        mu = jnp.mean(y, axis=-1, keepdims=True)
        c = y - mu
        var = jnp.mean(c * c, axis=-1, keepdims=True)
        out = c * lax.rsqrt(var + ln_eps) * g_ref[...] + beta_ref[...]
        out_ref[...] = out.reshape(bt, S, D).astype(out_ref.dtype)

    return kernel


def prepare_lxmert_params(params, *, compute_dtype=jnp.bfloat16):
    """One-time weight prep (transpose + bf16 cast), hoisted out of the hot path.

    nn.Linear weights are (out, in); pre-transpose so both the HBM->VMEM DMA and
    the MXU operands are bf16. Biases / LayerNorm params stay f32.
    """
    f32 = jnp.float32
    return {
        "wq": jnp.asarray(params["wq"]).T.astype(compute_dtype),    # (D, H)
        "wk": jnp.asarray(params["wk"]).T.astype(compute_dtype),    # (D, H)
        "wv": jnp.asarray(params["wv"]).T.astype(compute_dtype),    # (D, H)
        "wo": jnp.asarray(params["wo"]).T.astype(compute_dtype),    # (H, D)
        "bq": jnp.asarray(params["bq"]).reshape(1, -1).astype(f32),
        "bk": jnp.asarray(params["bk"]).reshape(1, -1).astype(f32),
        "bv": jnp.asarray(params["bv"]).reshape(1, -1).astype(f32),
        "bo": jnp.asarray(params["bo"]).reshape(1, -1).astype(f32),
        "gamma": jnp.asarray(params["gamma"]).reshape(1, -1).astype(f32),
        "beta": jnp.asarray(params["beta"]).reshape(1, -1).astype(f32),
    }


def _choose_batch_block(B, S, per_batch_bytes, *, target_rows=256,
                        max_unroll_batches=8, vmem_data_budget=16 * 2**20):
    """Pick Bt (divisor of B): Bt*S approaches target_rows, grid stays >= 2 steps,
    and double-buffered I/O blocks fit a VMEM data budget."""
    divisors = [d for d in range(1, B + 1) if B % d == 0]
    bt = 1
    for d in divisors:
        if d > max_unroll_batches:
            break
        if d > 1 and 2 * d * per_batch_bytes > vmem_data_budget:
            break
        bt = d
        if d * S >= target_rows:
            break
    # Keep >= 2 grid steps when possible (v7x has 2 TensorCores per chip).
    while bt > 1 and B // bt < 2:
        bt = max(d for d in divisors if d < bt)
    return bt


def lxmert_self_attention_layer(input_tensor, attention_mask, prepared_params, *,
                                num_heads, output_attentions=False, ln_eps=1e-12,
                                probs_dtype=jnp.float32, out_dtype=None):
    """Pallas implementation of LxmertSelfAttentionLayer.forward (eval mode)."""
    B, S, D = input_tensor.shape
    H = prepared_params["wq"].shape[1]        # head_size == num_heads * head_dim
    assert H % num_heads == 0
    head_dim = H // num_heads
    out_dtype = input_tensor.dtype if out_dtype is None else out_dtype

    # Mask: HF padding masks (B,1,1,Sk)/(B,Sk) collapse to (B,1,Sk) and are broadcast
    # over queries in-kernel; per-query masks (B,1,Sq,Sk)/(B,Sq,Sk) pass through as
    # (B,Sq,Sk). Self-attention => key length must equal S.
    if attention_mask is None:
        mask = jnp.zeros((B, 1, S), jnp.float32)
    else:
        am = jnp.asarray(attention_mask, jnp.float32)
        mask = am.reshape(B, -1, am.shape[-1])
        if mask.shape[1] not in (1, S):
            raise ValueError(f"unsupported attention_mask shape {am.shape}")
        if mask.shape[2] != S:
            raise ValueError("self-attention: mask key length must equal seq length")
    Mq, Sk = mask.shape[1], mask.shape[2]

    itemsize = lambda dt: jnp.dtype(dt).itemsize
    per_batch_bytes = (S * D * 4 + Mq * Sk * 4 + S * D * itemsize(out_dtype)
                       + (num_heads * S * Sk * itemsize(probs_dtype)
                          if output_attentions else 0))
    Bt = _choose_batch_block(B, S, per_batch_bytes)
    grid = (B // Bt,)

    weight_bytes = sum(prepared_params[k].size * itemsize(prepared_params[k].dtype)
                       for k in ("wq", "wk", "wv", "wo"))
    working = (2 * Bt * per_batch_bytes            # double-buffered I/O blocks
               + 2 * weight_bytes                  # (double-buffered) resident weights
               + 10 * Bt * S * max(H, D) * 4)      # q/k/v/ctx/attn/LN f32 temporaries
    vmem_limit = int(min(64 * 2**20, max(32 * 2**20, int(1.5 * working))))

    kernel = _make_kernel(Bt, num_heads, head_dim, ln_eps, output_attentions)

    in_specs = [
        pl.BlockSpec((Bt, S, D), lambda i: (i, 0, 0)),     # input_tensor
        pl.BlockSpec((Bt, Mq, Sk), lambda i: (i, 0, 0)),   # additive mask
        pl.BlockSpec((D, H), lambda i: (0, 0)),            # Wq^T (bf16)
        pl.BlockSpec((1, H), lambda i: (0, 0)),            # bq
        pl.BlockSpec((D, H), lambda i: (0, 0)),            # Wk^T (bf16)
        pl.BlockSpec((1, H), lambda i: (0, 0)),            # bk
        pl.BlockSpec((D, H), lambda i: (0, 0)),            # Wv^T (bf16)
        pl.BlockSpec((1, H), lambda i: (0, 0)),            # bv
        pl.BlockSpec((H, D), lambda i: (0, 0)),            # Wo^T (bf16)
        pl.BlockSpec((1, D), lambda i: (0, 0)),            # bo
        pl.BlockSpec((1, D), lambda i: (0, 0)),            # LayerNorm gamma
        pl.BlockSpec((1, D), lambda i: (0, 0)),            # LayerNorm beta
    ]

    out_shapes = [jax.ShapeDtypeStruct((B, S, D), out_dtype)]
    out_specs = [pl.BlockSpec((Bt, S, D), lambda i: (i, 0, 0))]
    if output_attentions:
        out_shapes.append(jax.ShapeDtypeStruct((B, num_heads, S, Sk), probs_dtype))
        out_specs.append(pl.BlockSpec((Bt, num_heads, S, Sk),
                                      lambda i: (i, 0, 0, 0)))
        out_shape = tuple(out_shapes)
        out_specs_final = out_specs
    else:
        out_shape = out_shapes[0]
        out_specs_final = out_specs[0]

    grid_spec = pltpu.PrefetchScalarGridSpec(
        num_scalar_prefetch=0,
        grid=grid,
        in_specs=in_specs,
        out_specs=out_specs_final,
    )

    outs = pl.pallas_call(
        kernel,
        out_shape=out_shape,
        grid_spec=grid_spec,
        compiler_params=pltpu.CompilerParams(
            dimension_semantics=("parallel",),
            vmem_limit_bytes=vmem_limit),
    )(input_tensor, mask,
      prepared_params["wq"], prepared_params["bq"],
      prepared_params["wk"], prepared_params["bk"],
      prepared_params["wv"], prepared_params["bv"],
      prepared_params["wo"], prepared_params["bo"],
      prepared_params["gamma"], prepared_params["beta"])

    if output_attentions:
        return outs[0], outs[1]
    return (outs,)


def _reference(x, attention_mask, params, num_heads, ln_eps=1e-12):
    """Plain-JAX (f32) reference mirroring the PyTorch forward."""
    B, S, D = x.shape
    H = params["wq"].shape[0]
    dh = H // num_heads

    q = x @ params["wq"].T + params["bq"]
    k = x @ params["wk"].T + params["bk"]
    v = x @ params["wv"].T + params["bv"]

    def split(t):
        return t.reshape(B, S, num_heads, dh).transpose(0, 2, 1, 3)

    qh, kh, vh = split(q), split(k), split(v)
    scores = jnp.einsum("bhqd,bhkd->bhqk", qh, kh) / math.sqrt(dh)
    if attention_mask is not None:
        scores = scores + attention_mask
    probs = jax.nn.softmax(scores, axis=-1)
    ctx = jnp.einsum("bhqk,bhkd->bhqd", probs, vh)
    ctx = ctx.transpose(0, 2, 1, 3).reshape(B, S, H)

    attn = ctx @ params["wo"].T + params["bo"]
    y = attn + x
    mu = y.mean(-1, keepdims=True)
    var = ((y - mu) ** 2).mean(-1, keepdims=True)
    out = (y - mu) / jnp.sqrt(var + ln_eps) * params["gamma"] + params["beta"]
    return out, probs


if __name__ == "__main__":
    # Small config consistent with LxmertSelfAttentionLayer.
    B, S = 2, 8
    hidden_size = 32
    num_heads = 4

    key = jax.random.PRNGKey(0)
    ks = jax.random.split(key, 12)
    x = jax.random.normal(ks[0], (B, S, hidden_size), jnp.float32)

    params = {
        "wq": 0.1 * jax.random.normal(ks[1], (hidden_size, hidden_size), jnp.float32),
        "bq": 0.1 * jax.random.normal(ks[2], (hidden_size,), jnp.float32),
        "wk": 0.1 * jax.random.normal(ks[3], (hidden_size, hidden_size), jnp.float32),
        "bk": 0.1 * jax.random.normal(ks[4], (hidden_size,), jnp.float32),
        "wv": 0.1 * jax.random.normal(ks[5], (hidden_size, hidden_size), jnp.float32),
        "bv": 0.1 * jax.random.normal(ks[6], (hidden_size,), jnp.float32),
        "wo": 0.1 * jax.random.normal(ks[7], (hidden_size, hidden_size), jnp.float32),
        "bo": 0.1 * jax.random.normal(ks[8], (hidden_size,), jnp.float32),
        "gamma": 1.0 + 0.1 * jax.random.normal(ks[9], (hidden_size,), jnp.float32),
        "beta": 0.1 * jax.random.normal(ks[10], (hidden_size,), jnp.float32),
    }

    # One-time weight prep (transpose + bf16 cast), outside the per-call hot path.
    prepared = prepare_lxmert_params(params)

    # HF-style additive padding mask (B, 1, 1, Sk): mask out last key of batch 1.
    mask = jnp.zeros((B, 1, 1, S), jnp.float32)
    mask = mask.at[1, 0, 0, -1].set(-10000.0)

    # Path 1: with attention probs (verifies both outputs).
    out, probs = lxmert_self_attention_layer(
        x, mask, prepared, num_heads=num_heads, output_attentions=True)
    out = jax.block_until_ready(out)
    probs = jax.block_until_ready(probs)

    # Path 2: default (no probs) path also lowers and runs.
    (out_noprobs,) = lxmert_self_attention_layer(
        x, mask, prepared, num_heads=num_heads)
    out_noprobs = jax.block_until_ready(out_noprobs)

    ref_out, ref_probs = _reference(x, mask, params, num_heads)
    # bf16 matmul operands => relaxed tolerance vs f32 reference.
    np.testing.assert_allclose(np.asarray(probs), np.asarray(ref_probs),
                               rtol=2e-2, atol=2e-2)
    np.testing.assert_allclose(np.asarray(out), np.asarray(ref_out),
                               rtol=2e-2, atol=2e-2)
    np.testing.assert_allclose(np.asarray(out_noprobs), np.asarray(ref_out),
                               rtol=2e-2, atol=2e-2)

    print("KERNEL_OK")
</pallas_src>

<mosaic_0001>
module attributes {stable_mosaic.version = 11 : i64} {
  func.func @kernel(%arg0: i32, %arg1: memref<1x8x32xf32, #tpu.memory_space<vmem>>, %arg2: memref<1x1x8xf32, #tpu.memory_space<vmem>>, %arg3: memref<32x32xbf16, #tpu.memory_space<vmem>>, %arg4: memref<1x32xf32, #tpu.memory_space<vmem>>, %arg5: memref<32x32xbf16, #tpu.memory_space<vmem>>, %arg6: memref<1x32xf32, #tpu.memory_space<vmem>>, %arg7: memref<32x32xbf16, #tpu.memory_space<vmem>>, %arg8: memref<1x32xf32, #tpu.memory_space<vmem>>, %arg9: memref<32x32xbf16, #tpu.memory_space<vmem>>, %arg10: memref<1x32xf32, #tpu.memory_space<vmem>>, %arg11: memref<1x32xf32, #tpu.memory_space<vmem>>, %arg12: memref<1x32xf32, #tpu.memory_space<vmem>>, %arg13: memref<1x8x32xf32, #tpu.memory_space<vmem>>, %arg14: memref<1x4x8x8xf32, #tpu.memory_space<vmem>>) attributes {dimension_semantics = [#tpu.dimension_semantics<parallel>], iteration_bounds = array<i64: 2>, scalar_prefetch = 0 : i64, scratch_operands = 0 : i64, tpu.core_type = #tpu.core_type<tc>, window_params = [{transform_indices = @transform_0, window_bounds = array<i64: 1, 8, 32>}, {transform_indices = @transform_1, window_bounds = array<i64: 1, 1, 8>}, {pipeline_mode = #tpu.pipeline_mode<synchronous>, transform_indices = @transform_2, window_bounds = array<i64: 32, 32>}, {pipeline_mode = #tpu.pipeline_mode<synchronous>, transform_indices = @transform_3, window_bounds = array<i64: 1, 32>}, {pipeline_mode = #tpu.pipeline_mode<synchronous>, transform_indices = @transform_4, window_bounds = array<i64: 32, 32>}, {pipeline_mode = #tpu.pipeline_mode<synchronous>, transform_indices = @transform_5, window_bounds = array<i64: 1, 32>}, {pipeline_mode = #tpu.pipeline_mode<synchronous>, transform_indices = @transform_6, window_bounds = array<i64: 32, 32>}, {pipeline_mode = #tpu.pipeline_mode<synchronous>, transform_indices = @transform_7, window_bounds = array<i64: 1, 32>}, {pipeline_mode = #tpu.pipeline_mode<synchronous>, transform_indices = @transform_8, window_bounds = array<i64: 32, 32>}, {pipeline_mode = #tpu.pipeline_mode<synchronous>, transform_indices = @transform_9, window_bounds = array<i64: 1, 32>}, {pipeline_mode = #tpu.pipeline_mode<synchronous>, transform_indices = @transform_10, window_bounds = array<i64: 1, 32>}, {pipeline_mode = #tpu.pipeline_mode<synchronous>, transform_indices = @transform_11, window_bounds = array<i64: 1, 32>}, {transform_indices = @transform_12, window_bounds = array<i64: 1, 8, 32>}, {transform_indices = @transform_13, window_bounds = array<i64: 1, 4, 8, 8>}]} {
    %c0 = arith.constant 0 : index
    %c0_0 = arith.constant 0 : index
    %c0_1 = arith.constant 0 : index
    %0 = vector.load %arg1[%c0, %c0_0, %c0_1] : memref<1x8x32xf32, #tpu.memory_space<vmem>>, vector<1x8x32xf32>
    %1 = vector.shape_cast %0 : vector<1x8x32xf32> to vector<8x32xf32>
    %2 = arith.truncf %1 : vector<8x32xf32> to vector<8x32xbf16>
    %c0_2 = arith.constant 0 : index
    %c0_3 = arith.constant 0 : index
    %3 = vector.load %arg3[%c0_2, %c0_3] : memref<32x32xbf16, #tpu.memory_space<vmem>>, vector<32x32xbf16>
    %cst = arith.constant dense<0.000000e+00> : vector<8x32xf32>
    %4 = tpu.matmul %2, %3, %cst {dimension_numbers = #tpu.dot_dimension_numbers<[1], [0], [0], [1], [0, 0, 1, 1], [], []>} : vector<8x32xbf16>, vector<32x32xbf16>, vector<8x32xf32> -> vector<8x32xf32>
    %c0_4 = arith.constant 0 : index
    %c0_5 = arith.constant 0 : index
    %5 = vector.load %arg4[%c0_4, %c0_5] : memref<1x32xf32, #tpu.memory_space<vmem>>, vector<1x32xf32>
    %6 = vector.broadcast %5 : vector<1x32xf32> to vector<8x32xf32>
    %7 = arith.addf %4, %6 : vector<8x32xf32>
    %cst_6 = arith.constant 0.353553385 : f32
    %8 = vector.broadcast %cst_6 : f32 to vector<8x32xf32>
    %9 = arith.mulf %7, %8 : vector<8x32xf32>
    %c0_7 = arith.constant 0 : index
    %c0_8 = arith.constant 0 : index
    %10 = vector.load %arg5[%c0_7, %c0_8] : memref<32x32xbf16, #tpu.memory_space<vmem>>, vector<32x32xbf16>
    %cst_9 = arith.constant dense<0.000000e+00> : vector<8x32xf32>
    %11 = tpu.matmul %2, %10, %cst_9 {dimension_numbers = #tpu.dot_dimension_numbers<[1], [0], [0], [1], [0, 0, 1, 1], [], []>} : vector<8x32xbf16>, vector<32x32xbf16>, vector<8x32xf32> -> vector<8x32xf32>
    %c0_10 = arith.constant 0 : index
    %c0_11 = arith.constant 0 : index
    %12 = vector.load %arg6[%c0_10, %c0_11] : memref<1x32xf32, #tpu.memory_space<vmem>>, vector<1x32xf32>
    %13 = vector.broadcast %12 : vector<1x32xf32> to vector<8x32xf32>
    %14 = arith.addf %11, %13 : vector<8x32xf32>
    %c0_12 = arith.constant 0 : index
    %c0_13 = arith.constant 0 : index
    %15 = vector.load %arg7[%c0_12, %c0_13] : memref<32x32xbf16, #tpu.memory_space<vmem>>, vector<32x32xbf16>
    %cst_14 = arith.constant dense<0.000000e+00> : vector<8x32xf32>
    %16 = tpu.matmul %2, %15, %cst_14 {dimension_numbers = #tpu.dot_dimension_numbers<[1], [0], [0], [1], [0, 0, 1, 1], [], []>} : vector<8x32xbf16>, vector<32x32xbf16>, vector<8x32xf32> -> vector<8x32xf32>
    %c0_15 = arith.constant 0 : index
    %c0_16 = arith.constant 0 : index
    %17 = vector.load %arg8[%c0_15, %c0_16] : memref<1x32xf32, #tpu.memory_space<vmem>>, vector<1x32xf32>
    %18 = vector.broadcast %17 : vector<1x32xf32> to vector<8x32xf32>
    %19 = arith.addf %16, %18 : vector<8x32xf32>
    %20 = vector.shape_cast %9 : vector<8x32xf32> to vector<1x8x32xf32>
    %21 = arith.truncf %20 : vector<1x8x32xf32> to vector<1x8x32xbf16>
    %22 = vector.shape_cast %14 : vector<8x32xf32> to vector<1x8x32xf32>
    %23 = arith.truncf %22 : vector<1x8x32xf32> to vector<1x8x32xbf16>
    %24 = vector.shape_cast %19 : vector<8x32xf32> to vector<1x8x32xf32>
    %25 = arith.truncf %24 : vector<1x8x32xf32> to vector<1x8x32xbf16>
    %c0_17 = arith.constant 0 : index
    %c0_18 = arith.constant 0 : index
    %c0_19 = arith.constant 0 : index
    %26 = vector.load %arg2[%c0_17, %c0_18, %c0_19] : memref<1x1x8xf32, #tpu.memory_space<vmem>>, vector<1x1x8xf32>
    %27 = vector.shape_cast %26 : vector<1x1x8xf32> to vector<1x8xf32>
    %28 = vector.shape_cast %27 : vector<1x8xf32> to vector<1x8xf32>
    %29 = vector.broadcast %28 : vector<1x8xf32> to vector<8x8xf32>
    %30 = vector.shape_cast %21 : vector<1x8x32xbf16> to vector<8x32xbf16>
    %31 = vector.shape_cast %23 : vector<1x8x32xbf16> to vector<8x32xbf16>
    %32 = vector.shape_cast %25 : vector<1x8x32xbf16> to vector<8x32xbf16>
    %33 = vector.extract_strided_slice %30 {offsets = [0, 0], sizes = [8, 8], strides = [1, 1]} : vector<8x32xbf16> to vector<8x8xbf16>
    %34 = vector.extract_strided_slice %31 {offsets = [0, 0], sizes = [8, 8], strides = [1, 1]} : vector<8x32xbf16> to vector<8x8xbf16>
    %35 = vector.extract_strided_slice %32 {offsets = [0, 0], sizes = [8, 8], strides = [1, 1]} : vector<8x32xbf16> to vector<8x8xbf16>
    %cst_20 = arith.constant dense<0.000000e+00> : vector<8x8xf32>
    %36 = tpu.matmul %33, %34, %cst_20 {dimension_numbers = #tpu.dot_dimension_numbers<[1], [1], [0], [0], [0, 0, 1, 0], [], []>} : vector<8x8xbf16>, vector<8x8xbf16>, vector<8x8xf32> -> vector<8x8xf32>
    %37 = arith.addf %36, %29 : vector<8x8xf32>
    %cst_21 = arith.constant dense<0xFF800000> : vector<8xf32>
    %38 = vector.multi_reduction <maximumf>, %37, %cst_21 [1] : vector<8x8xf32> to vector<8xf32>
    %39 = vector.shape_cast %38 : vector<8xf32> to vector<8x1xf32>
    %40 = vector.broadcast %39 : vector<8x1xf32> to vector<8x8xf32>
    %41 = arith.subf %37, %40 : vector<8x8xf32>
    %42 = math.exp %41 : vector<8x8xf32>
    %cst_22 = arith.constant dense<0.000000e+00> : vector<8xf32>
    %43 = vector.multi_reduction <add>, %42, %cst_22 [1] : vector<8x8xf32> to vector<8xf32>
    %44 = vector.shape_cast %43 : vector<8xf32> to vector<8x1xf32>
    %45 = tpu.reciprocal %44 : vector<8x1xf32> -> vector<8x1xf32>
    %46 = vector.broadcast %45 : vector<8x1xf32> to vector<8x8xf32>
    %47 = arith.mulf %42, %46 : vector<8x8xf32>
    %48 = arith.truncf %47 : vector<8x8xf32> to vector<8x8xbf16>
    %cst_23 = arith.constant dense<0.000000e+00> : vector<8x8xf32>
    %49 = tpu.matmul %48, %35, %cst_23 {dimension_numbers = #tpu.dot_dimension_numbers<[1], [0], [0], [1], [0, 0, 1, 1], [], []>} : vector<8x8xbf16>, vector<8x8xbf16>, vector<8x8xf32> -> vector<8x8xf32>
    %50 = vector.shape_cast %47 : vector<8x8xf32> to vector<1x8x8xf32>
    %51 = vector.extract_strided_slice %30 {offsets = [0, 8], sizes = [8, 8], strides = [1, 1]} : vector<8x32xbf16> to vector<8x8xbf16>
    %52 = vector.extract_strided_slice %31 {offsets = [0, 8], sizes = [8, 8], strides = [1, 1]} : vector<8x32xbf16> to vector<8x8xbf16>
    %53 = vector.extract_strided_slice %32 {offsets = [0, 8], sizes = [8, 8], strides = [1, 1]} : vector<8x32xbf16> to vector<8x8xbf16>
    %cst_24 = arith.constant dense<0.000000e+00> : vector<8x8xf32>
    %54 = tpu.matmul %51, %52, %cst_24 {dimension_numbers = #tpu.dot_dimension_numbers<[1], [1], [0], [0], [0, 0, 1, 0], [], []>} : vector<8x8xbf16>, vector<8x8xbf16>, vector<8x8xf32> -> vector<8x8xf32>
    %55 = arith.addf %54, %29 : vector<8x8xf32>
    %cst_25 = arith.constant dense<0xFF800000> : vector<8xf32>
    %56 = vector.multi_reduction <maximumf>, %55, %cst_25 [1] : vector<8x8xf32> to vector<8xf32>
    %57 = vector.shape_cast %56 : vector<8xf32> to vector<8x1xf32>
    %58 = vector.broadcast %57 : vector<8x1xf32> to vector<8x8xf32>
    %59 = arith.subf %55, %58 : vector<8x8xf32>
    %60 = math.exp %59 : vector<8x8xf32>
    %cst_26 = arith.constant dense<0.000000e+00> : vector<8xf32>
    %61 = vector.multi_reduction <add>, %60, %cst_26 [1] : vector<8x8xf32> to vector<8xf32>
    %62 = vector.shape_cast %61 : vector<8xf32> to vector<8x1xf32>
    %63 = tpu.reciprocal %62 : vector<8x1xf32> -> vector<8x1xf32>
    %64 = vector.broadcast %63 : vector<8x1xf32> to vector<8x8xf32>
    %65 = arith.mulf %60, %64 : vector<8x8xf32>
    %66 = arith.truncf %65 : vector<8x8xf32> to vector<8x8xbf16>
    %cst_27 = arith.constant dense<0.000000e+00> : vector<8x8xf32>
    %67 = tpu.matmul %66, %53, %cst_27 {dimension_numbers = #tpu.dot_dimension_numbers<[1], [0], [0], [1], [0, 0, 1, 1], [], []>} : vector<8x8xbf16>, vector<8x8xbf16>, vector<8x8xf32> -> vector<8x8xf32>
    %68 = vector.shape_cast %65 : vector<8x8xf32> to vector<1x8x8xf32>
    %69 = vector.extract_strided_slice %30 {offsets = [0, 16], sizes = [8, 8], strides = [1, 1]} : vector<8x32xbf16> to vector<8x8xbf16>
    %70 = vector.extract_strided_slice %31 {offsets = [0, 16], sizes = [8, 8], strides = [1, 1]} : vector<8x32xbf16> to vector<8x8xbf16>
    %71 = vector.extract_strided_slice %32 {offsets = [0, 16], sizes = [8, 8], strides = [1, 1]} : vector<8x32xbf16> to vector<8x8xbf16>
    %cst_28 = arith.constant dense<0.000000e+00> : vector<8x8xf32>
    %72 = tpu.matmul %69, %70, %cst_28 {dimension_numbers = #tpu.dot_dimension_numbers<[1], [1], [0], [0], [0, 0, 1, 0], [], []>} : vector<8x8xbf16>, vector<8x8xbf16>, vector<8x8xf32> -> vector<8x8xf32>
    %73 = arith.addf %72, %29 : vector<8x8xf32>
    %cst_29 = arith.constant dense<0xFF800000> : vector<8xf32>
    %74 = vector.multi_reduction <maximumf>, %73, %cst_29 [1] : vector<8x8xf32> to vector<8xf32>
    %75 = vector.shape_cast %74 : vector<8xf32> to vector<8x1xf32>
    %76 = vector.broadcast %75 : vector<8x1xf32> to vector<8x8xf32>
    %77 = arith.subf %73, %76 : vector<8x8xf32>
    %78 = math.exp %77 : vector<8x8xf32>
    %cst_30 = arith.constant dense<0.000000e+00> : vector<8xf32>
    %79 = vector.multi_reduction <add>, %78, %cst_30 [1] : vector<8x8xf32> to vector<8xf32>
    %80 = vector.shape_cast %79 : vector<8xf32> to vector<8x1xf32>
    %81 = tpu.reciprocal %80 : vector<8x1xf32> -> vector<8x1xf32>
    %82 = vector.broadcast %81 : vector<8x1xf32> to vector<8x8xf32>
    %83 = arith.mulf %78, %82 : vector<8x8xf32>
    %84 = arith.truncf %83 : vector<8x8xf32> to vector<8x8xbf16>
    %cst_31 = arith.constant dense<0.000000e+00> : vector<8x8xf32>
    %85 = tpu.matmul %84, %71, %cst_31 {dimension_numbers = #tpu.dot_dimension_numbers<[1], [0], [0], [1], [0, 0, 1, 1], [], []>} : vector<8x8xbf16>, vector<8x8xbf16>, vector<8x8xf32> -> vector<8x8xf32>
    %86 = vector.shape_cast %83 : vector<8x8xf32> to vector<1x8x8xf32>
    %87 = vector.extract_strided_slice %30 {offsets = [0, 24], sizes = [8, 8], strides = [1, 1]} : vector<8x32xbf16> to vector<8x8xbf16>
    %88 = vector.extract_strided_slice %31 {offsets = [0, 24], sizes = [8, 8], strides = [1, 1]} : vector<8x32xbf16> to vector<8x8xbf16>
    %89 = vector.extract_strided_slice %32 {offsets = [0, 24], sizes = [8, 8], strides = [1, 1]} : vector<8x32xbf16> to vector<8x8xbf16>
    %cst_32 = arith.constant dense<0.000000e+00> : vector<8x8xf32>
    %90 = tpu.matmul %87, %88, %cst_32 {dimension_numbers = #tpu.dot_dimension_numbers<[1], [1], [0], [0], [0, 0, 1, 0], [], []>} : vector<8x8xbf16>, vector<8x8xbf16>, vector<8x8xf32> -> vector<8x8xf32>
    %91 = arith.addf %90, %29 : vector<8x8xf32>
    %cst_33 = arith.constant dense<0xFF800000> : vector<8xf32>
    %92 = vector.multi_reduction <maximumf>, %91, %cst_33 [1] : vector<8x8xf32> to vector<8xf32>
    %93 = vector.shape_cast %92 : vector<8xf32> to vector<8x1xf32>
    %94 = vector.broadcast %93 : vector<8x1xf32> to vector<8x8xf32>
    %95 = arith.subf %91, %94 : vector<8x8xf32>
    %96 = math.exp %95 : vector<8x8xf32>
    %cst_34 = arith.constant dense<0.000000e+00> : vector<8xf32>
    %97 = vector.multi_reduction <add>, %96, %cst_34 [1] : vector<8x8xf32> to vector<8xf32>
    %98 = vector.shape_cast %97 : vector<8xf32> to vector<8x1xf32>
    %99 = tpu.reciprocal %98 : vector<8x1xf32> -> vector<8x1xf32>
    %100 = vector.broadcast %99 : vector<8x1xf32> to vector<8x8xf32>
    %101 = arith.mulf %96, %100 : vector<8x8xf32>
    %102 = arith.truncf %101 : vector<8x8xf32> to vector<8x8xbf16>
    %cst_35 = arith.constant dense<0.000000e+00> : vector<8x8xf32>
    %103 = tpu.matmul %102, %89, %cst_35 {dimension_numbers = #tpu.dot_dimension_numbers<[1], [0], [0], [1], [0, 0, 1, 1], [], []>} : vector<8x8xbf16>, vector<8x8xbf16>, vector<8x8xf32> -> vector<8x8xf32>
    %104 = vector.shape_cast %101 : vector<8x8xf32> to vector<1x8x8xf32>
    %105 = tpu.concatenate %49, %67, %85, %103 in 1 : vector<8x8xf32>, vector<8x8xf32>, vector<8x8xf32>, vector<8x8xf32> -> vector<8x32xf32>
    %106 = tpu.concatenate %50, %68, %86, %104 in 0 : vector<1x8x8xf32>, vector<1x8x8xf32>, vector<1x8x8xf32>, vector<1x8x8xf32> -> vector<4x8x8xf32>
    %c0_36 = arith.constant 0 : index
    %c0_37 = arith.constant 0 : index
    %c0_38 = arith.constant 0 : index
    %c0_39 = arith.constant 0 : index
    %107 = vector.load %arg14[%c0_36, %c0_37, %c0_38, %c0_39] : memref<1x4x8x8xf32, #tpu.memory_space<vmem>>, vector<1x4x8x8xf32>
    %108 = vector.shape_cast %107 : vector<1x4x8x8xf32> to vector<4x8x8xf32>
    %109 = vector.shape_cast %106 : vector<4x8x8xf32> to vector<1x4x8x8xf32>
    tpu.vector_store %arg14[%c0_36, %c0_37, %c0_38, %c0_39], %109 {strides = array<i32>} : memref<1x4x8x8xf32, #tpu.memory_space<vmem>>, vector<1x4x8x8xf32>,
    %110 = arith.truncf %105 : vector<8x32xf32> to vector<8x32xbf16>
    %c0_40 = arith.constant 0 : index
    %c0_41 = arith.constant 0 : index
    %111 = vector.load %arg9[%c0_40, %c0_41] : memref<32x32xbf16, #tpu.memory_space<vmem>>, vector<32x32xbf16>
    %cst_42 = arith.constant dense<0.000000e+00> : vector<8x32xf32>
    %112 = tpu.matmul %110, %111, %cst_42 {dimension_numbers = #tpu.dot_dimension_numbers<[1], [0], [0], [1], [0, 0, 1, 1], [], []>} : vector<8x32xbf16>, vector<32x32xbf16>, vector<8x32xf32> -> vector<8x32xf32>
    %c0_43 = arith.constant 0 : index
    %c0_44 = arith.constant 0 : index
    %113 = vector.load %arg10[%c0_43, %c0_44] : memref<1x32xf32, #tpu.memory_space<vmem>>, vector<1x32xf32>
    %114 = vector.broadcast %113 : vector<1x32xf32> to vector<8x32xf32>
    %115 = arith.addf %112, %114 : vector<8x32xf32>
    %116 = arith.addf %115, %1 : vector<8x32xf32>
    %cst_45 = arith.constant dense<0.000000e+00> : vector<8xf32>
    %117 = vector.multi_reduction <add>, %116, %cst_45 [1] : vector<8x32xf32> to vector<8xf32>
    %118 = vector.shape_cast %117 : vector<8xf32> to vector<8x1xf32>
    %cst_46 = arith.constant 3.200000e+01 : f32
    %119 = vector.broadcast %cst_46 : f32 to vector<8x1xf32>
    %120 = arith.divf %118, %119 : vector<8x1xf32>
    %121 = vector.broadcast %120 : vector<8x1xf32> to vector<8x32xf32>
    %122 = arith.subf %116, %121 : vector<8x32xf32>
    %123 = arith.mulf %122, %122 : vector<8x32xf32>
    %cst_47 = arith.constant dense<0.000000e+00> : vector<8xf32>
    %124 = vector.multi_reduction <add>, %123, %cst_47 [1] : vector<8x32xf32> to vector<8xf32>
    %125 = vector.shape_cast %124 : vector<8xf32> to vector<8x1xf32>
    %cst_48 = arith.constant 3.200000e+01 : f32
    %126 = vector.broadcast %cst_48 : f32 to vector<8x1xf32>
    %127 = arith.divf %125, %126 : vector<8x1xf32>
    %cst_49 = arith.constant 9.99999996E-13 : f32
    %128 = vector.broadcast %cst_49 : f32 to vector<8x1xf32>
    %129 = arith.addf %127, %128 : vector<8x1xf32>
    %130 = math.rsqrt %129 : vector<8x1xf32>
    %131 = vector.broadcast %130 : vector<8x1xf32> to vector<8x32xf32>
    %132 = arith.mulf %122, %131 : vector<8x32xf32>
    %c0_50 = arith.constant 0 : index
    %c0_51 = arith.constant 0 : index
    %133 = vector.load %arg11[%c0_50, %c0_51] : memref<1x32xf32, #tpu.memory_space<vmem>>, vector<1x32xf32>
    %134 = vector.broadcast %133 : vector<1x32xf32> to vector<8x32xf32>
    %135 = arith.mulf %132, %134 : vector<8x32xf32>
    %c0_52 = arith.constant 0 : index
    %c0_53 = arith.constant 0 : index
    %136 = vector.load %arg12[%c0_52, %c0_53] : memref<1x32xf32, #tpu.memory_space<vmem>>, vector<1x32xf32>
    %137 = vector.broadcast %136 : vector<1x32xf32> to vector<8x32xf32>
    %138 = arith.addf %135, %137 : vector<8x32xf32>
    %139 = vector.shape_cast %138 : vector<8x32xf32> to vector<1x8x32xf32>
    %c0_54 = arith.constant 0 : index
    %c0_55 = arith.constant 0 : index
    %c0_56 = arith.constant 0 : index
    %140 = vector.load %arg13[%c0_54, %c0_55, %c0_56] : memref<1x8x32xf32, #tpu.memory_space<vmem>>, vector<1x8x32xf32>
    tpu.vector_store %arg13[%c0_54, %c0_55, %c0_56], %139 {strides = array<i32>} : memref<1x8x32xf32, #tpu.memory_space<vmem>>, vector<1x8x32xf32>,
    return
  }
  func.func @transform_0(%arg0: i32) -> (i32, i32, i32) {
    %c0_i32 = arith.constant 0 : i32
    %c0_i32_0 = arith.constant 0 : i32
    %c0_i32_1 = arith.constant 0 : i32
    return %arg0, %c0_i32, %c0_i32_0 : i32, i32, i32
  }
  func.func @transform_1(%arg0: i32) -> (i32, i32, i32) {
    %c0_i32 = arith.constant 0 : i32
    %c0_i32_0 = arith.constant 0 : i32
    %c0_i32_1 = arith.constant 0 : i32
    return %arg0, %c0_i32, %c0_i32_0 : i32, i32, i32
  }
  func.func @transform_2(%arg0: i32) -> (i32, i32) {
    %c0_i32 = arith.constant 0 : i32
    %c0_i32_0 = arith.constant 0 : i32
    %c0_i32_1 = arith.constant 0 : i32
    return %c0_i32, %c0_i32_0 : i32, i32
  }
  func.func @transform_3(%arg0: i32) -> (i32, i32) {
    %c0_i32 = arith.constant 0 : i32
    %c0_i32_0 = arith.constant 0 : i32
    %c0_i32_1 = arith.constant 0 : i32
    return %c0_i32, %c0_i32_0 : i32, i32
  }
  func.func @transform_4(%arg0: i32) -> (i32, i32) {
    %c0_i32 = arith.constant 0 : i32
    %c0_i32_0 = arith.constant 0 : i32
    %c0_i32_1 = arith.constant 0 : i32
    return %c0_i32, %c0_i32_0 : i32, i32
  }
  func.func @transform_5(%arg0: i32) -> (i32, i32) {
    %c0_i32 = arith.constant 0 : i32
    %c0_i32_0 = arith.constant 0 : i32
    %c0_i32_1 = arith.constant 0 : i32
    return %c0_i32, %c0_i32_0 : i32, i32
  }
  func.func @transform_6(%arg0: i32) -> (i32, i32) {
    %c0_i32 = arith.constant 0 : i32
    %c0_i32_0 = arith.constant 0 : i32
    %c0_i32_1 = arith.constant 0 : i32
    return %c0_i32, %c0_i32_0 : i32, i32
  }
  func.func @transform_7(%arg0: i32) -> (i32, i32) {
    %c0_i32 = arith.constant 0 : i32
    %c0_i32_0 = arith.constant 0 : i32
    %c0_i32_1 = arith.constant 0 : i32
    return %c0_i32, %c0_i32_0 : i32, i32
  }
  func.func @transform_8(%arg0: i32) -> (i32, i32) {
    %c0_i32 = arith.constant 0 : i32
    %c0_i32_0 = arith.constant 0 : i32
    %c0_i32_1 = arith.constant 0 : i32
    return %c0_i32, %c0_i32_0 : i32, i32
  }
  func.func @transform_9(%arg0: i32) -> (i32, i32) {
    %c0_i32 = arith.constant 0 : i32
    %c0_i32_0 = arith.constant 0 : i32
    %c0_i32_1 = arith.constant 0 : i32
    return %c0_i32, %c0_i32_0 : i32, i32
  }
  func.func @transform_10(%arg0: i32) -> (i32, i32) {
    %c0_i32 = arith.constant 0 : i32
    %c0_i32_0 = arith.constant 0 : i32
    %c0_i32_1 = arith.constant 0 : i32
    return %c0_i32, %c0_i32_0 : i32, i32
  }
  func.func @transform_11(%arg0: i32) -> (i32, i32) {
    %c0_i32 = arith.constant 0 : i32
    %c0_i32_0 = arith.constant 0 : i32
    %c0_i32_1 = arith.constant 0 : i32
    return %c0_i32, %c0_i32_0 : i32, i32
  }
  func.func @transform_12(%arg0: i32) -> (i32, i32, i32) {
    %c0_i32 = arith.constant 0 : i32
    %c0_i32_0 = arith.constant 0 : i32
    %c0_i32_1 = arith.constant 0 : i32
    return %arg0, %c0_i32, %c0_i32_0 : i32, i32, i32
  }
  func.func @transform_13(%arg0: i32) -> (i32, i32, i32, i32) {
    %c0_i32 = arith.constant 0 : i32
    %c0_i32_0 = arith.constant 0 : i32
    %c0_i32_1 = arith.constant 0 : i32
    %c0_i32_2 = arith.constant 0 : i32
    return %arg0, %c0_i32, %c0_i32_0, %c0_i32_1 : i32, i32, i32, i32
  }
}

</mosaic_0001>

<bundles_post_ra>
// kernel: tpu_custom_call.1
= control target key start
LH: loop header
LB: loop body
LE: loop exit
PB: predicated region body
PF: predicated region fallthrough
CT: control target
= control target key end

     0   :  { %s2594_s0 = inlined_call_operand.hbm [shape: f32[2,8,32], index: 0, kind: input, shape index: {}]   ;;  %s2595_s1 = inlined_call_operand.hbm [shape: f32[2,1,8], index: 1, kind: input, shape index: {}]   ;;  %s2596_s2 = inlined_call_operand.hbm [shape: bf16[32,32], index: 2, kind: input, shape index: {}]   ;;  %s2597_s3 = inlined_call_operand.vmem [shape: f32[1,32], index: 3, kind: input, shape index: {}]   ;;  %s2598_s4 = inlined_call_operand.hbm [shape: bf16[32,32], index: 4, kind: input, shape index: {}]   ;;  %s2599_s5 = inlined_call_operand.vmem [shape: f32[1,32], index: 5, kind: input, shape index: {}]   ;;  %s2600_s6 = inlined_call_operand.hbm [shape: bf16[32,32], index: 6, kind: input, shape index: {}]   ;;  %s2601_s7 = inlined_call_operand.vmem [shape: f32[1,32], index: 7, kind: input, shape index: {}]   ;;  %s2602_s8 = inlined_call_operand.hbm [shape: bf16[32,32], index: 8, kind: input, shape index: {}]   ;;  %s2603_s9 = inlined_call_operand.vmem [shape: f32[1,32], index: 9, kind: input, shape index: {}]   ;;  %s2604_s10 = inlined_call_operand.vmem [shape: f32[1,32], index: 10, kind: input, shape index: {}]   ;;  %s2605_s11 = inlined_call_operand.vmem [shape: f32[1,32], index: 11, kind: input, shape index: {}]   ;;  %s2606_s12 = inlined_call_operand.hbm [shape: f32[2,8,32], index: 12, kind: output, shape index: {0}]   ;;  %s2607_s13 = inlined_call_operand.hbm [shape: f32[2,4,8,8], index: 13, kind: output, shape index: {1}]  }
   0x1   :  { %2617 = sst [smem:[#allocation28_spill]] %s2594_s0 }
   0x2   :  { %2618 = sst [smem:[#allocation29_spill]] %s2596_s2 }
   0x3   :  { %2619 = sst [smem:[#allocation30_spill]] %s2598_s4 }
   0x4   :  { %2620 = sst [smem:[#allocation31_spill]] %s2600_s6 }
   0x5   :  { %2621 = sst [smem:[#allocation32_spill]] %s2602_s8 }
   0x6   :  { %19 = vsyncpa [#allocation3], 0 }
   0x7   :  { %21 = vsyncpa [#allocation3 + $0x1], 0 }
   0x8   :  { %22 = vsyncpa [#allocation6], 0 }
   0x9   :  { %24 = vsyncpa [#allocation6 + $0x1], 0 }
   0xa   :  { %25 = vsyncpa [#allocation9], 0 }
   0xb   :  { %26 = vsyncpa [#allocation12], 0 }
   0xc   :  { %27 = vsyncpa [#allocation4], 0 }
   0xd   :  { %29 = vsyncpa [#allocation4 + $0x1], 0 }
   0xe   :  { %30 = vsyncpa [#allocation15], 0 }
   0xf   :  { %32 = vsyncpa [#allocation15 + $0x1], 0  ;;  %s2176_s25 = smov 0   ;;  %s2178_s26 = smov 0  }
  0x10   :  { %s2180_s27 = smov 0   ;;  %s2182_s28 = smov 0  }
  0x11 LB: > { %2622 = sst [smem:[#allocation23_spill]] %s2073_s25  ;;  %s2087_s29 = smov [#allocation7]   ;;  %s2085_s28 = sphi %s2182_s28, %s2653_s28   ;;  %s2081_s27 = sphi %s2180_s27, %s2655_s27   ;;  %s2077_s26 = sphi %s2178_s26, %s2657_s26   ;;  %s2073_s25 = sphi %s2176_s25, %s2656_s25  }
  0x12   : > { %2623 = sst [smem:[#allocation24_spill]] %s2081_s27  ;;  %s369_s30 = sshll.u32 %s2087_s29, 4  ;;  %s370_s30 = int_to_ptr.vmem [resolvable:$true] %s369_s30 }
  0x13   : > { %s2197_s14 = sadd.s32 4294967295, %s2085_s28   ;;  %p1521_p0 = scmp.ge.s32.totalorder %s2085_s28, 1 }
  0x14   : > { %p2611_p1 = scmp.eq.s32.totalorder %s2197_s14, 0  ;;  %p357_p2 = scmp.lt.s32.totalorder %s2085_s28, 3 }
  0x15   : > { %s2088_s16 = smov [#allocation8]   ;;  %s2089_s19 = smov [#allocation10]  }
  0x16   : > { %p2202_p3 = pnand %p1521_p0, %p357_p2  ;;  %s385_s17 = sshll.u32 %s2088_s16, 4  ;;  %s2215_s17 = int_to_ptr.vmem [resolvable:$true] %s385_s17 }
  0x17   : > { %s401_s20 = sshll.u32 %s2089_s19, 4  ;;  %s1826_s21 = scalar_lea.vmem %s370_s30, 256  ;;  %s2217_s20 = int_to_ptr.vmem [resolvable:$true] %s401_s20 }
  0x18   : > { %s2624_s15 = scalar_select %p2202_p3, 1, 0 }
  0x19   : > { %p1705_p5 = pneg %p2202_p3  ;;  %p1827_p8 = scmp.ne.s32.totalorder %s370_s30, %s1826_s21 }
  0x1a   : > { %p1834_p11 = scmp.lt.s32.totalorder %s370_s30, %s370_s30  ;;  %p1835_p12 = scmp.lt.s32.totalorder %s1826_s21, %s1826_s21 }
  0x1b   : > { %p2211_p6 = pnand %p1705_p5, %p2611_p1 }
  0x1c   : > { %p1836_p13 = por %p1835_p12, %p1834_p11 }
  0x1d   : > { %p1817_p7 = pneg %p2211_p6 }
  0x1f   : > { %p1829_p9 = pnand %p1827_p8, %p1817_p7 }
  0x21   : > { %p1830_p10 = pneg %p1829_p9 }
  0x23   : > { %p1837_p0 = pnand %p1836_p13, %p1830_p10 }
  0x25   : > { %1840 = shalt.err (!%p1837_p0)
}
  0x26   : > { %s2090_s22 = smov 64   ;;  %s2091_s23 = smov 4  }
  0x27   : > { %s2626_s2 = sld [smem:[#allocation29_spill]]  ;;  %s1852_s16 = scalar_lea.vmem %s2215_s17, 256 }
  0x28   : > { %p1853_p2 = scmp.ne.s32.totalorder %s2215_s17, %s1852_s16  ;;  %p1860_p9 = scmp.lt.s32.totalorder %s2215_s17, %s2215_s17 }
  0x29   : > { %p1861_p10 = scmp.lt.s32.totalorder %s1852_s16, %s1852_s16 }
  0x2a   : > { %p1855_p5 = pnand %p1853_p2, %p1817_p7 }
  0x2b   : > { %p1862_p11 = por %p1861_p10, %p1860_p9 }
  0x2c   : > { %p1856_p8 = pneg %p1855_p5 }
  0x2d   : > { %1708 = dma.hbm_to_vmem [thread:$0]  (!%p2211_p6), %s2626_s2, 256, %s370_s30, [#allocation6], %s2090_s22, %s2090_s22, %s2091_s23  }
  0x2e   : > { %p1863_p12 = pnand %p1862_p11, %p1856_p8 }
  0x30   : > { %1866 = shalt.err (!%p1863_p12)
}
  0x31   : > { %s2627_s4 = sld [smem:[#allocation30_spill]]  ;;  %s1878_s21 = scalar_lea.vmem %s2217_s20, 256 }
  0x32   : > { %p1879_p13 = scmp.ne.s32.totalorder %s2217_s20, %s1878_s21  ;;  %p1886_p5 = scmp.lt.s32.totalorder %s2217_s20, %s2217_s20 }
  0x33   : > { %p1887_p8 = scmp.lt.s32.totalorder %s1878_s21, %s1878_s21 }
  0x34   : > { %p1881_p0 = pnand %p1879_p13, %p1817_p7 }
  0x35   : > { %p1888_p9 = por %p1887_p8, %p1886_p5 }
  0x36   : > { %p1882_p2 = pneg %p1881_p0 }
  0x37   : > { %1711 = dma.hbm_to_vmem [thread:$0]  (!%p2211_p6), %s2627_s4, 256, %s2215_s17, [#allocation9], %s2090_s22, %s2090_s22, %s2091_s23  }
  0x38   : > { %p1889_p10 = pnand %p1888_p9, %p1882_p2 }
  0x3a   : > { %1892 = shalt.err (!%p1889_p10)
}
  0x3b   : > { %s2628_s6 = sld [smem:[#allocation31_spill]]  ;;  %s2092_s29 = smov [#allocation11]  }
  0x3c   : > { %s417_s16 = sshll.u32 %s2092_s29, 4  ;;  %s418_s16 = int_to_ptr.vmem [resolvable:$true] %s417_s16 }
  0x3d   : > { %s1904_s19 = scalar_lea.vmem %s418_s16, 256  ;;  %p1912_p0 = scmp.lt.s32.totalorder %s418_s16, %s418_s16 }
  0x3e   : > { %p1905_p11 = scmp.ne.s32.totalorder %s418_s16, %s1904_s19  ;;  %p1913_p2 = scmp.lt.s32.totalorder %s1904_s19, %s1904_s19 }
  0x40   : > { %p1907_p12 = pnand %p1905_p11, %p1817_p7  ;;  %p1914_p5 = por %p1913_p2, %p1912_p0 }
  0x41   : > { %1714 = dma.hbm_to_vmem [thread:$0]  (!%p2211_p6), %s2628_s6, 256, %s2217_s20, [#allocation9], %s2090_s22, %s2090_s22, %s2091_s23  }
  0x42   : > { %p1908_p13 = pneg %p1907_p12 }
  0x44   : > { %p1915_p8 = pnand %p1914_p5, %p1908_p13 }
  0x46   : > { %1918 = shalt.err (!%p1915_p8)
}
  0x47   : > { %s2629_s8 = sld [smem:[#allocation32_spill]]  ;;  %s1520_s18 = sadd.s32 4294967294, %s2085_s28  }
  0x48   : > { %s2277_s21 = sadd.s32 1, %s2085_s28   ;;  %s45_s17 = sadd.s32 1, %s2081_s27 }
  0x49   : > { %2630 = sst [smem:[#allocation25_spill]] %s2277_s21  ;;  %s42_s24 = ssub.s32 %s2085_s28, %s2277_s21 }
  0x4a   : > { %p43_p7 = scmp.eq.s32.totalorder %s42_s24, 0  ;;  %p52_p9 = scmp.ne.s32.totalorder %s2081_s27, %s2077_s26 }
  0x4b   : > { %p53_p10 = scmp.eq.s32.totalorder %s2085_s28, 0  ;;  %p58_p11 = scmp.ne.s32.totalorder %s2077_s26, %s2073_s25 }
  0x4c   : > { %s2288_s29 = scalar_select %p43_p7, %s2081_s27, %s45_s17  }
  0x4d   : > { %1717 = dma.hbm_to_vmem [thread:$0]  (!%p2211_p6), %s2629_s8, 256, %s418_s16, [#allocation12], %s2090_s22, %s2090_s22, %s2091_s23  }
  0x4e   : > { %2631 = sst [smem:[#allocation26_spill]] %s2288_s29  ;;  %p2290_p12 = por %p53_p10, %p52_p9 }
  0x4f   : > { %p2296_p6 = por %p2611_p1, %p58_p11  ;;  %p318_p13 = scmp.eq.s32.totalorder %s2197_s14, 1 }
  0x50   : > { %p324_p0 = scmp.eq.s32.totalorder %s1520_s18, 1  ;;  %p1736_p2 = scmp.lt.s32.totalorder %s2085_s28, 2 }
  0x51   : > { %s2633_s22 = scalar_select %p2296_p6, 1, 0 }
  0x52   : > { %s2303_s23 = sand.u32 1, %s2081_s27   ;;  %p2305_p5 = por %p318_p13, %p52_p9 }
  0x53   : > { %p2309_p8 = por %p324_p0, %p58_p11  ;;  %s1527_s30 = sshll.u32 %s2303_s23, 3 }
  0x54   : > { %s2634_s16 = scalar_select %p2305_p5, 1, 0 }
  0x55   : > { %s2635_s20 = scalar_select %p2309_p8, 1, 0 }
  0x56   : > { %s1528_s24 = sshll.u32 %s2085_s28, 7  ;;  %s2637_s0 = sld [smem:[#allocation28_spill]] }
  0x57   : > { %2636 = sst [smem:[#allocation27_spill]] %s2635_s20  ;;  %s444_s18 = scalar_lea.vmem [#allocation2], %s1527_s30 }
  0x58   : > { %s451_s6 = sshll.u32 %s444_s18, 4  ;;  %p2324_p7 = pnand %p1736_p2, %p2290_p12  ;;  %s2320_s6 = int_to_ptr.vmem [resolvable:$true] %s451_s6 }
  0x59   : > { %s441_s27 = scalar_lea.sflag [#allocation3], %s2303_s23 }
  0x5a   : > { %p1921_p10 = pneg %p2324_p7 }
  0x5c   : > { %s2318_s4 = scalar_lea.hbm %s2637_s0, %s1528_s24  ;;  %s1924_s19 = scalar_lea.hbm %s2637_s0, 256 }
  0x5d   : > { %s1919_s21 = scalar_lea.hbm %s2318_s4, 128  ;;  %p1925_p12 = scmp.lt.s32.totalorder %s2318_s4, %s2637_s0 }
  0x5e   : > { %p1920_p9 = scmp.ne.s32.totalorder %s2318_s4, %s1919_s21  ;;  %p1926_p0 = scmp.lt.s32.totalorder %s1924_s19, %s1919_s21 }
  0x60   : > { %p1922_p11 = pnand %p1921_p10, %p1920_p9  ;;  %p1927_p2 = por %p1926_p0, %p1925_p12 }
  0x62   : > { %p1923_p13 = pneg %p1922_p11 }
  0x64   : > { %p1928_p4 = pnand %p1927_p2, %p1923_p13 }
  0x66   : > { %1931 = shalt.err (!%p1928_p4)
}
  0x67   : > { %s1932_s18 = scalar_lea.vmem %s2320_s6, 128  ;;  %s2093_s2 = smov [#allocation2]  }
  0x68   : > { %p1933_p1 = scmp.ne.s32.totalorder %s2320_s6, %s1932_s18  ;;  %s1937_s30 = sshll.u32 %s2093_s2, 4  ;;  %s1938_s30 = int_to_ptr.vmem [resolvable:$false] %s1937_s30 }
  0x69   : > { %s1939_s29 = scalar_lea.vmem %s1938_s30, 256  ;;  %p1940_p8 = scmp.lt.s32.totalorder %s2320_s6, %s1938_s30 }
  0x6a   : > { %p1935_p9 = pnand %p1933_p1, %p1921_p10  ;;  %p1941_p5 = scmp.lt.s32.totalorder %s1939_s29, %s1932_s18 }
  0x6c   : > { %p1936_p11 = pneg %p1935_p9  ;;  %p1942_p6 = por %p1941_p5, %p1940_p8 }
  0x6e   : > { %p1943_p12 = pnand %p1942_p6, %p1936_p11 }
  0x70   : > { %1946 = shalt.err (!%p1943_p12)
}
  0x71   : > { %1721 = dma.hbm_to_vmem [thread:$0]  (!%p2324_p7), %s2318_s4, 128, %s2320_s6, %s441_s27  }
  0x72   : > { %s1529_s21 = sshll.u32 %s2085_s28, 4  ;;  %s461_s19 = scalar_lea.vmem [#allocation5], %s2303_s23 }
  0x73   : > { %s468_s24 = sshll.u32 %s461_s19, 4  ;;  %s466_s30 = scalar_lea.hbm %s2595_s1, %s1529_s21  ;;  %s469_s24 = int_to_ptr.vmem [resolvable:$true] %s468_s24 }
  0x74   : > { %s2639_s29 = sand.u32 1, %s2085_s28   ;;  %s1947_s0 = scalar_lea.hbm %s466_s30, 16 }
  0x75   : > { %s459_s18 = scalar_lea.sflag [#allocation6], %s2639_s29  ;;  %p1948_p1 = scmp.ne.s32.totalorder %s466_s30, %s1947_s0 }
  0x76   : > { %s1952_s4 = scalar_lea.hbm %s2595_s1, 32  ;;  %p1953_p5 = scmp.lt.s32.totalorder %s466_s30, %s2595_s1 }
  0x77   : > { %p1950_p4 = pnand %p1948_p1, %p1921_p10  ;;  %p1954_p8 = scmp.lt.s32.totalorder %s1952_s4, %s1947_s0 }
  0x79   : > { %p1951_p6 = pneg %p1950_p4  ;;  %p1955_p13 = por %p1954_p8, %p1953_p5 }
  0x7b   : > { %p1956_p0 = pnand %p1955_p13, %p1951_p6 }
  0x7d   : > { %1959 = shalt.err (!%p1956_p0)
}
  0x7e   : > { %s1960_s23 = scalar_lea.vmem %s469_s24, 16  ;;  %s2094_s21 = smov [#allocation5]  }
  0x7f   : > { %p1961_p2 = scmp.ne.s32.totalorder %s469_s24, %s1960_s23  ;;  %s1965_s19 = sshll.u32 %s2094_s21, 4  ;;  %s1966_s19 = int_to_ptr.vmem [resolvable:$false] %s1965_s19 }
  0x80   : > { %s1967_s25 = scalar_lea.vmem %s1966_s19, 32  ;;  %p1968_p12 = scmp.lt.s32.totalorder %s469_s24, %s1966_s19 }
  0x81   : > { %p1963_p9 = pnand %p1961_p2, %p1921_p10  ;;  %p1969_p1 = scmp.lt.s32.totalorder %s1967_s25, %s1960_s23 }
  0x83   : > { %p1964_p11 = pneg %p1963_p9  ;;  %p1970_p4 = por %p1969_p1, %p1968_p12 }
  0x85   : > { %p1971_p3 = pnand %p1970_p4, %p1964_p11 }
  0x87   : > { %1974 = shalt.err (!%p1971_p3)
}
  0x88   : > { %1724 = dma.hbm_to_vmem [thread:$0]  (!%p2324_p7), %s466_s30, 16, %s469_s24, %s459_s18  }
  0x89   : > { %p2640_p6 = scmp.ne.s32.totalorder %s2624_s15, 0 }
  0x8a   : > { %s2378_s0 = sand.u32 (!%p2640_p6), 1, %s2077_s26   ;;  %p2641_p10 = scmp.ne.s32.totalorder (!%p2640_p6), %s2633_s22, 0 }
  0x8b   : > { %477 = sbr.rel (%p2640_p6) target bundleno = 1841 (0x731), region = 68  ;;  %s1531_s20 = sshll.u32 (!%p2640_p6), %s2378_s0, 3 }
  0x8c   : > { %s480_s17 = scalar_lea.sflag (!%p2640_p6), [#allocation3], %s2378_s0  ;;  %s483_s2 = scalar_lea.vmem (!%p2640_p6), [#allocation2], %s1531_s20 }
  0x90   : > { %2044 = dma.done.wait (%p2641_p10), %s480_s17, 128  }
  0x91   : > { %2046 = vsyncadd (%p2641_p10), %s480_s17, 4294967168  ;;  %s488_s8 = sand.u32 1, %s2197_s14   ;;  %s491_s24 = scalar_lea.vmem [#allocation5], %s2378_s0 }
  0x92   : > { %s489_s15 = scalar_lea.sflag [#allocation6], %s488_s8 }
  0x93   : > { %2048 = dma.done.wait (%p2641_p10), %s489_s15, 16  }
  0x94   : > { %2050 = vsyncadd (%p2641_p10), %s489_s15, 4294967280  ;;  %p2642_p3 = scmp.eq.s32.totalorder %s2197_s14, 0 }
  0x96   : > { %2052 = dma.done.wait (%p2642_p3), [#allocation6], 256   ;;  %p2643_p7 = pmov %p2642_p3 }
  0x97   : > { %p2644_p5 = pmov %p2642_p3 }
  0x98   : > { %2054 = vsyncadd (%p2643_p7), [#allocation6], 4294967040 }
  0x99   : > { %2056 = dma.done.wait (%p2644_p5), [#allocation9], 512   ;;  %p2645_p8 = pmov %p2642_p3 }
  0x9a   : > { %p2646_p13 = pmov %p2642_p3 }
  0x9b   : > { %2058 = vsyncadd (%p2645_p8), [#allocation9], 4294966784 }
  0x9c   : > { %2060 = dma.done.wait (%p2646_p13), [#allocation12], 256   ;;  %p2647_p0 = pmov %p2642_p3 }
  0x9d   : > { %v2095_v0 = vmov 0.0   ;;  %vm2096_vm0 = vmmov 0   ;;  %v1789_v1 = vld [vmem:[#allocation7 + $0x8] sm:$0xff]   ;;  %v1790_v2 = vld [vmem:[#allocation8 + $0x8] sm:$0xff]   ;;  %v1791_v3 = vld [vmem:[#allocation7] sm:$0xff]   ;;  %vm585_vm1 = vcmask 261120  }
  0x9e   : > { %2062 = vsyncadd (%p2647_p0), [#allocation12], 4294967040  ;;  %1601 = vmatprep.subr.bf16.mxu0 %v2095_v0  ;;  %1609 = vmatprep.subr.bf16.mxu1 %v2095_v0  ;;  %v1792_v4 = vld [vmem:[#allocation8] sm:$0xff]   ;;  %v1538_v7 = vld [vmem:[%s2597_s3] ss:$0 sm:$0xff]  ;;  %vm766_vm2 = vcmask 64512  }
  0x9f   : > { %1605 = vmatprep.mubr.msk.bf16.mxu0 %vm2096_vm0, %v2095_v0  ;;  %1613 = vmatprep.mubr.msk.bf16.mxu1 %vm2096_vm0, %v2095_v0  ;;  %v2414_v5 = vld [vmem:[%s483_s2] sm:$0xff]  ;;  %s2097_s4 = smov 112   ;;  %s2098_s6 = smov 120   ;;  %v1794_v24 = vld [vmem:[#allocation10] sm:$0xff]   ;;  %vm828_vm3 = vcmask 1043456   ;;  %vm1218_vm4 = vcmask 130048  }
  0xa0   : > { %1602 = vmatpush3.bf16.msra.mxu0 %v1789_v1  ;;  %1610 = vmatpush3.bf16.msra.mxu1 %v1790_v2  ;;  %v561_v6 = vpack.c.bf16 %v2414_v5, %v2414_v5  ;;  %v1542_v8 = vld [vmem:[%s2599_s5] ss:$0 sm:$0xff]  ;;  %s2099_s27 = smov 104   ;;  %s1537_s19 = sshll.u32 %s2378_s0, 5  ;;  %vm1220_vm5 = vcmask 195584  }
  0xa1   : > { %1603 = vmatprep.subr.bf16.mxu0 %v2095_v0  ;;  %1611 = vmatprep.subr.bf16.mxu1 %v2095_v0  ;;  %v1793_v23 = vld [vmem:[#allocation10 + $0x8] sm:$0xff]   ;;  %s2482_s25 = scalar_lea.vmem [#allocation14], %s1537_s19  ;;  %s2100_s17 = smov 8  }
  0xa2   : > { %v1550_v34 = vld [vmem:[%s491_s24] ss:$0 sm:$0xff]  ;;  %s2101_s2 = smov 16   ;;  %s2102_s8 = smov 24  }
  0xa3   : > { %v1546_v41 = vld [vmem:[%s2601_s7] ss:$0 sm:$0xff]  ;;  %s1572_s22 = sshll.u32 %s2197_s14, 9  ;;  %s1357_s30 = sshll.u32 %s2482_s25, 4  ;;  %s2524_s30 = int_to_ptr.vmem [resolvable:$true] %s1357_s30 }
  0xa4   : > { %1604 = vmatpush3.bf16.msra.mxu0 %v1791_v3  ;;  %1612 = vmatpush3.bf16.msra.mxu1 %v1792_v4  ;;  %p2648_p9 = scmp.ne.s32.totalorder %s2634_s16, 0  ;;  %s2103_s23 = smov [#allocation14]  }
  0xa5   : > { %1617 = vmatprep.subr.bf16.mxu0 %v2095_v0  ;;  %1625 = vmatprep.subr.bf16.mxu1 %v2095_v0  ;;  %s1979_s21 = sshll.u32 %s2103_s23, 4  ;;  %s1980_s21 = int_to_ptr.vmem [resolvable:$false] %s1979_s21 }
  0xa6   : > { %s1981_s19 = scalar_lea.vmem %s1980_s21, 1024  ;;  %p1982_p1 = scmp.lt.s32.totalorder %s2524_s30, %s1980_s21 }
  0xa7   : > { %1606 = vmatmul.mubr.msk.bf16.vlgmr.msra.gmra.mxu0 %vm585_vm1, %v561_v6  ;;  %1614 = vmatmul.mubr.msk.bf16.vlgmr.msra.gmra.mxu1 %vm585_vm1, %v561_v6 }
  0xa8   : > { %1621 = vmatprep.mubr.msk.bf16.mxu0 %vm2096_vm0, %v2095_v0  ;;  %1627 = vmatprep.mubr.msk.bf16.mxu1 %vm2096_vm0, %v2095_v0 }
  0xa9   : > { %1618 = vmatpush3.bf16.msra.mxu0 %v1793_v23 }
  0xaa   : > { %1619 = vmatprep.subr.bf16.mxu0 %v2095_v0 }
  0xad   : > { %1620 = vmatpush3.bf16.msra.mxu0 %v1794_v24 }
  0xae   : > { %1631 = vmatprep.subr.bf16.mxu0 %v2095_v0 }
  0xb0   : > { %1622 = vmatmul.mubr.msk.bf16.vlgmr.msra.gmra.mxu0 %vm585_vm1, %v561_v6 }
  0xb1   : > { %1633 = vmatprep.mubr.msk.bf16.mxu0 %vm2096_vm0, %v2095_v0 }
 0x167   : > { %v623_v9 = vpop.f32.mrf.mxu0  ;;  %v687_v11 = vpop.f32.mrf.mxu1 }
 0x168   : > { %v624_v10 = vadd.f32 %v1538_v7, %v623_v9  ;;  %v688_v12 = vadd.f32 %v1542_v8, %v687_v11 }
 0x169   : > { %v1607_v13 = vpop.f32.mrf.mxu0  ;;  %v1615_v15 = vpop.f32.mrf.mxu1 }
 0x16a   : > { %v629_v14 = vmul.f32 0.35355338, %v624_v10  ;;  %v757_v16 = vpack.c.bf16 %v688_v12, %v688_v12 }
 0x16b   : > { %v626_v17 = vpop.f32.mrf.mxu0  ;;  %v690_v18 = vpop.f32.mrf.mxu1 }
 0x16c   : > { %v756_v19 = vpack.c.bf16 %v629_v14, %v629_v14  ;;  %987 = vrot.lane.b32.xlu1 %v757_v16, %s2097_s4  ;;  %876 = vrot.lane.b32.xlu0 %v757_v16, %s2098_s6  ;;  %v771_v21 = vsel %vm766_vm2, %v757_v16, 0 }
 0x16d   : > { %v1608_v20 = vpop.f32.mrf.mxu0  ;;  %v1616_v22 = vpop.f32.mrf.mxu1  ;;  %1626 = vmatpush3.bf16.xpose.msra.mxu1 %v771_v21 }
 0x16e   : > { %1637 = vmatprep.subr.bf16.mxu1 %v2095_v0 }
 0x170   : > { %985 = vrot.lane.b32.xlu1 %v756_v19, %s2097_s4  ;;  %873 = vrot.lane.b32.xlu0 %v756_v19, %s2098_s6  ;;  %v750_v42 = vpop.f32.mrf.mxu0 }
 0x171   : > { %v751_v43 = vadd.f32 %v1546_v41, %v750_v42 }
 0x172   : > { %v1623_v44 = vpop.f32.mrf.mxu0 }
 0x173   : > { %v758_v45 = vpack.c.bf16 %v751_v43, %v751_v43 }
 0x174   : > { %1095 = vrot.lane.b32.xlu1 %v756_v19, %s2099_s27  ;;  %1097 = vrot.lane.b32.xlu0 %v757_v16, %s2099_s27  ;;  %v753_v46 = vpop.f32.mrf.mxu0 }
 0x175   : > { %1628 = vmatmul.mubr.msk.bf16.vlgmr.msra.gmra.mxu1 %vm766_vm2, %v756_v19  ;;  %v830_v47 = vsel %vm828_vm3, %v758_v45, 0 }
 0x176   : > { %1639 = vmatprep.mubr.msk.bf16.mxu1 %vm2096_vm0, %v2095_v0  ;;  %v1624_v48 = vpop.f32.mrf.mxu0  ;;  %1632 = vmatpush3.bf16.msra.mxu0 %v830_v47 }
 0x177   : > { %1643 = vmatprep.subr.bf16.mxu0 %v2095_v0 }
 0x1de   : > { %v877_v25 = vpop.permute.xlu0 %876  ;;  %v988_v27 = vpop.permute.xlu1 %987 }
 0x1df   : > { %v882_v26 = vsel %vm766_vm2, %v877_v25, 0  ;;  %v993_v29 = vsel %vm766_vm2, %v988_v27, 0 }
 0x1e0   : > { %1638 = vmatpush3.bf16.xpose.msra.mxu1 %v882_v26 }
 0x1e1   : > { %1649 = vmatprep.subr.bf16.mxu1 %v2095_v0 }
 0x1e2   : > { %v874_v28 = vpop.permute.xlu0 %873  ;;  %v986_v31 = vpop.permute.xlu1 %985 }
 0x1e6   : > { %v1098_v30 = vpop.permute.xlu0 %1097  ;;  %v1096_v33 = vpop.permute.xlu1 %1095 }
 0x1e7   : > { %1640 = vmatmul.mubr.msk.bf16.vlgmr.msra.gmra.mxu1 %vm766_vm2, %v874_v28  ;;  %v1103_v32 = vsel %vm766_vm2, %v1098_v30, 0 }
 0x1e8   : > { %1650 = vmatpush3.bf16.xpose.msra.mxu1 %v993_v29  ;;  %1651 = vmatprep.mubr.msk.bf16.mxu1 %vm2096_vm0, %v2095_v0 }
 0x1e9   : > { %1661 = vmatprep.subr.bf16.mxu1 %v2095_v0 }
 0x1ef   : > { %1652 = vmatmul.mubr.msk.bf16.vlgmr.msra.gmra.mxu1 %vm766_vm2, %v986_v31 }
 0x1f0   : > { %1662 = vmatpush3.bf16.xpose.msra.mxu1 %v1103_v32  ;;  %1663 = vmatprep.mubr.msk.bf16.mxu1 %vm2096_vm0, %v2095_v0 }
 0x1f1   : > { %1673 = vmatprep.subr.bf16.mxu1 %v2095_v0 }
 0x1f7   : > { %1664 = vmatmul.mubr.msk.bf16.vlgmr.msra.gmra.mxu1 %vm766_vm2, %v1096_v33 }
 0x1f8   : > { %1677 = vmatprep.mubr.msk.bf16.mxu1 %vm2096_vm0, %v2095_v0 }
 0x235   : > { %v807_v35 = vpop.f32.mrf.mxu1 }
 0x236   : > { %v808_v36 = vadd.f32 %v1550_v34, %v807_v35 }
 0x237   : > { %v1629_v37 = vpop.f32.mrf.mxu1 }
 0x238   : > { %v813_v38 = vsel %vm766_vm2, %v808_v36, -inf }
 0x239   : > { %814 = vmax.xlane.f32.xlu0 %v813_v38  ;;  %v810_v39 = vpop.f32.mrf.mxu1 }
 0x23b   : > { %v1630_v40 = vpop.f32.mrf.mxu1 }
 0x2a7   : > { %v918_v49 = vpop.f32.mrf.mxu1 }
 0x2a8   : > { %v919_v50 = vadd.f32 %v1550_v34, %v918_v49 }
 0x2a9   : > { %v1641_v51 = vpop.f32.mrf.mxu1 }
 0x2aa   : > { %v924_v52 = vsel %vm766_vm2, %v919_v50, -inf  ;;  %v1795_v51 = vld [vmem:[#allocation11 + $0x8] sm:$0xff]  }
 0x2ab   : > { %925 = vmax.xlane.f32.xlu1 %v924_v52  ;;  %v921_v53 = vpop.f32.mrf.mxu1  ;;  %1674 = vmatpush3.bf16.msra.mxu1 %v1795_v51 }
 0x2ac   : > { %1675 = vmatprep.subr.bf16.mxu1 %v2095_v0 }
 0x2ad   : > { %v1642_v54 = vpop.f32.mrf.mxu1 }
 0x2ae   : > { %v1796_v54 = vld [vmem:[#allocation11] sm:$0xff]  }
 0x2af   : > { %v1029_v55 = vpop.f32.mrf.mxu1  ;;  %1676 = vmatpush3.bf16.msra.mxu1 %v1796_v54 }
 0x2b0   : > { %v1030_v56 = vadd.f32 %v1550_v34, %v1029_v55 }
 0x2b1   : > { %v1653_v57 = vpop.f32.mrf.mxu1 }
 0x2b2   : > { %v1035_v58 = vsel %vm766_vm2, %v1030_v56, -inf }
 0x2b3   : > { %1036 = vmax.xlane.f32.xlu0 %v1035_v58  ;;  %v1032_v59 = vpop.f32.mrf.mxu1 }
 0x2b5   : > { %v1654_v60 = vpop.f32.mrf.mxu1 }
 0x2b7   : > { %v1139_v61 = vpop.f32.mrf.mxu1 }
 0x2b8   : > { %v1140_v62 = vadd.f32 %v1550_v34, %v1139_v61 }
 0x2b9   : > { %v1665_v63 = vpop.f32.mrf.mxu1 }
 0x2ba   : > { %v1145_v1 = vsel %vm766_vm2, %v1140_v62, -inf }
 0x2bb   : > { %1146 = vmax.xlane.f32.xlu0 %v1145_v1  ;;  %v1142_v2 = vpop.f32.mrf.mxu1 }
 0x2bd   : > { %v1666_v3 = vpop.f32.mrf.mxu1 }
 0x2c2   : > { %v815_v4 = vpop.xlane.xlu0 %814 }
 0x2c3   : > { %v816_v6 = vsub.f32 %v808_v36, %v815_v4 }
 0x2c5   : > { %v817_v7 = vmul.f32 1.442695, %v816_v6 }
 0x2c7   : > { %1797 = vpow2.f32 %v817_v7 }
 0x2d4   : > { %v1798_v8 = vpop.eup %1797 }
 0x2d5   : > { %v819_v9 = vsel %vm766_vm2, %v1798_v8, 0.0 }
 0x2d6   : > { %820 = vadd.xlane.f32.xlu1 %v819_v9  ;;  %v1559_v9 = vld [vmem:[%s2603_s9] ss:$0 sm:$0xff] }
 0x2e7   : > { %937 = vrot.lane.b32.xlu1 %v758_v45, %s2098_s6  ;;  %s1331_s6 = scalar_lea.sflag [#allocation15], %s2378_s0 }
 0x334   : > { %v926_v10 = vpop.xlane.xlu1 %925 }
 0x335   : > { %v927_v11 = vsub.f32 %v919_v50, %v926_v10 }
 0x337   : > { %v928_v12 = vmul.f32 1.442695, %v927_v11 }
 0x339   : > { %1799 = vpow2.f32 %v928_v12 }
 0x33c   : > { %v1037_v13 = vpop.xlane.xlu0 %1036 }
 0x33d   : > { %v1038_v14 = vsub.f32 %v1030_v56, %v1037_v13 }
 0x33f   : > { %v1039_v15 = vmul.f32 1.442695, %v1038_v14 }
 0x341   : > { %1801 = vpow2.f32 %v1039_v15 }
 0x344   : > { %v1147_v16 = vpop.xlane.xlu0 %1146 }
 0x345   : > { %v1148_v17 = vsub.f32 %v1140_v62, %v1147_v16 }
 0x346   : > { %v1800_v18 = vpop.eup %1799 }
 0x347   : > { %v1149_v19 = vmul.f32 1.442695, %v1148_v17  ;;  %v930_v20 = vsel %vm766_vm2, %v1800_v18, 0.0 }
 0x348   : > { %931 = vadd.xlane.f32.xlu0 %v930_v20 }
 0x349   : > { %1803 = vpow2.f32 %v1149_v19 }
 0x34e   : > { %v1802_v21 = vpop.eup %1801 }
 0x34f   : > { %v1041_v22 = vsel %vm766_vm2, %v1802_v21, 0.0 }
 0x350   : > { %1042 = vadd.xlane.f32.xlu1 %v1041_v22 }
 0x356   : > { %v1804_v23 = vpop.eup %1803 }
 0x357   : > { %v1151_v24 = vsel %vm766_vm2, %v1804_v23, 0.0 }
 0x358   : > { %1152 = vadd.xlane.f32.xlu0 %v1151_v24 }
 0x35f   : > { %v821_v25 = vpop.xlane.xlu1 %820 }
 0x360   : > { %1805 = vrcp.f32 %v821_v25 }
 0x361   : > { %1157 = vrot.lane.b32.xlu1 %v758_v45, %s2099_s27  ;;  %s1975_s27 = scalar_lea.vmem %s2524_s30, 512 }
 0x362   : > { %p1976_p2 = scmp.ne.s32.totalorder %s2524_s30, %s1975_s27  ;;  %p1983_p4 = scmp.lt.s32.totalorder %s1981_s19, %s1975_s27 }
 0x363   : > { %v938_v27 = vpop.permute.xlu1 %937 }
 0x364   : > { %v943_v30 = vsel %vm828_vm3, %v938_v27, 0  ;;  %p1977_p11 = pnand %p1976_p2, %p2648_p9  ;;  %p1984_p6 = por %p1983_p4, %p1982_p1 }
 0x366   : > { %p1978_p12 = pneg %p1977_p11 }
 0x368   : > { %p1985_p10 = pnand %p1984_p6, %p1978_p12 }
 0x36d   : > { %v1806_v26 = vpop.eup %1805 }
 0x36e   : > { %1047 = vrot.lane.b32.xlu0 %v758_v45, %s2097_s4  ;;  %v823_v28 = vmul.f32 %v1806_v26, %v1798_v8  ;;  %s2522_s4 = scalar_lea.hbm %s2607_s13, %s1572_s22 }
 0x370   : > { %v824_v29 = vpack.c.bf16 %v823_v28, %v823_v28  ;;  %1222 = vst.msk [vmem:[%s2482_s25] sm:$0xff] %vm766_vm2, %v823_v28 }
 0x372   : > { %1634 = vmatmul.mubr.msk.bf16.vlgmr.msra.gmra.mxu0 %vm766_vm2, %v824_v29 }
 0x373   : > { %1644 = vmatpush3.bf16.msra.mxu0 %v943_v30  ;;  %1645 = vmatprep.mubr.msk.bf16.mxu0 %vm2096_vm0, %v2095_v0 }
 0x374   : > { %1655 = vmatprep.subr.bf16.mxu0 %v2095_v0 }
 0x3d1   : > { %v932_v31 = vpop.xlane.xlu0 %931 }
 0x3d2   : > { %1807 = vrcp.f32 %v932_v31 }
 0x3d9   : > { %v1043_v32 = vpop.xlane.xlu1 %1042 }
 0x3da   : > { %1809 = vrcp.f32 %v1043_v32 }
 0x3dd   : > { %v1158_v41 = vpop.permute.xlu1 %1157 }
 0x3de   : > { %v1163_v43 = vsel %vm828_vm3, %v1158_v41, 0 }
 0x3df   : > { %v1808_v33 = vpop.eup %1807 }
 0x3e0   : > { %v934_v34 = vmul.f32 %v1808_v33, %v1800_v18 }
 0x3e1   : > { %v1153_v35 = vpop.xlane.xlu0 %1152 }
 0x3e2   : > { %1811 = vrcp.f32 %v1153_v35  ;;  %v935_v36 = vpack.c.bf16 %v934_v34, %v934_v34  ;;  %1223 = vst.msk [vmem:[%s2482_s25 + $0x8] sm:$0xff] %vm766_vm2, %v934_v34 }
 0x3e4   : > { %1646 = vmatmul.mubr.msk.bf16.vlgmr.msra.gmra.mxu0 %vm766_vm2, %v935_v36 }
 0x3e5   : > { %v1048_v37 = vpop.permute.xlu0 %1047  ;;  %1657 = vmatprep.mubr.msk.bf16.mxu0 %vm2096_vm0, %v2095_v0 }
 0x3e6   : > { %v1053_v38 = vsel %vm828_vm3, %v1048_v37, 0 }
 0x3e7   : > { %v1810_v39 = vpop.eup %1809  ;;  %1656 = vmatpush3.bf16.msra.mxu0 %v1053_v38 }
 0x3e8   : > { %1667 = vmatprep.subr.bf16.mxu0 %v2095_v0  ;;  %v1045_v40 = vmul.f32 %v1810_v39, %v1802_v21 }
 0x3ea   : > { %v1046_v42 = vpack.c.bf16 %v1045_v40, %v1045_v40  ;;  %1224 = vst.msk [vmem:[%s2482_s25 + $0x10] sm:$0xff] %vm766_vm2, %v1045_v40 }
 0x3ec   : > { %1658 = vmatmul.mubr.msk.bf16.vlgmr.msra.gmra.mxu0 %vm766_vm2, %v1046_v42 }
 0x3ed   : > { %1668 = vmatpush3.bf16.msra.mxu0 %v1163_v43  ;;  %1669 = vmatprep.mubr.msk.bf16.mxu0 %vm2096_vm0, %v2095_v0 }
 0x3ef   : > { %v1812_v44 = vpop.eup %1811 }
 0x3f0   : > { %v1155_v45 = vmul.f32 %v1812_v44, %v1804_v23 }
 0x3f2   : > { %v1156_v46 = vpack.c.bf16 %v1155_v45, %v1155_v45  ;;  %1225 = vst.msk [vmem:[%s2482_s25 + $0x18] sm:$0xff] %vm766_vm2, %v1155_v45 }
 0x3f4   : > { %1670 = vmatmul.mubr.msk.bf16.vlgmr.msra.gmra.mxu0 %vm766_vm2, %v1156_v46 }
 0x432   : > { %v866_v47 = vpop.f32.mrf.mxu0 }
 0x434   : > { %v1635_v48 = vpop.f32.mrf.mxu0 }
 0x436   : > { %v869_v49 = vpop.f32.mrf.mxu0 }
 0x438   : > { %v1636_v50 = vpop.f32.mrf.mxu0 }
 0x4a4   : > { %v979_v52 = vpop.f32.mrf.mxu0 }
 0x4a5   : > { %1206 = vrot.lane.b32.xlu1 %v979_v52, %s2100_s17 }
 0x4a6   : > { %v1647_v53 = vpop.f32.mrf.mxu0 }
 0x4a8   : > { %v982_v55 = vpop.f32.mrf.mxu0 }
 0x4aa   : > { %v1648_v56 = vpop.f32.mrf.mxu0 }
 0x4ac   : > { %v1089_v57 = vpop.f32.mrf.mxu0 }
 0x4ad   : > { %1210 = vrot.lane.b32.xlu0 %v1089_v57, %s2101_s2 }
 0x4ae   : > { %v1659_v58 = vpop.f32.mrf.mxu0 }
 0x4b0   : > { %v1092_v59 = vpop.f32.mrf.mxu0 }
 0x4b2   : > { %v1660_v60 = vpop.f32.mrf.mxu0 }
 0x4b4   : > { %v1199_v61 = vpop.f32.mrf.mxu0 }
 0x4b5   : > { %1214 = vrot.lane.b32.xlu1 %v1199_v61, %s2102_s8 }
 0x4b6   : > { %v1671_v62 = vpop.f32.mrf.mxu0 }
 0x4b8   : > { %v1202_v0 = vpop.f32.mrf.mxu0 }
 0x4ba   : > { %v1672_v63 = vpop.f32.mrf.mxu0 }
 0x517   : > { %v1207_v1 = vpop.permute.xlu1 %1206 }
 0x518   : > { %v1217_v3 = vsel %vm766_vm2, %v866_v47, %v1207_v1 }
 0x51f   : > { %v1211_v2 = vpop.permute.xlu0 %1210 }
 0x520   : > { %v1219_v4 = vsel %vm1218_vm4, %v1217_v3, %v1211_v2 }
 0x527   : > { %v1215_v6 = vpop.permute.xlu1 %1214 }
 0x528   : > { %v1221_v7 = vsel %vm1220_vm5, %v1219_v4, %v1215_v6 }
 0x529   : > { %v1226_v8 = vpack.c.bf16 %v1221_v7, %v1221_v7 }
 0x52b   : > { %1678 = vmatmul.mubr.msk.bf16.vlgmr.msra.gmra.mxu1 %vm585_vm1, %v1226_v8 }
 0x5eb   : > { %v1287_v10 = vpop.f32.mrf.mxu1 }
 0x5ec   : > { %v1288_v11 = vadd.f32 %v1559_v9, %v1287_v10 }
 0x5ed   : > { %v1679_v12 = vpop.f32.mrf.mxu1 }
 0x5ee   : > { %v1293_v13 = vadd.f32 %v1288_v11, %v2414_v5 }
 0x5ef   : > { %v1290_v14 = vpop.f32.mrf.mxu1 }
 0x5f0   : > { %v1294_v15 = vsel %vm585_vm1, %v1293_v13, 0.0 }
 0x5f1   : > { %1295 = vadd.xlane.f32.xlu0 %v1294_v15  ;;  %v1680_v16 = vpop.f32.mrf.mxu1 }
 0x67a   : > { %v1296_v17 = vpop.xlane.xlu0 %1295 }
 0x67b   : > { %v1298_v18 = vmul.f32 0.03125, %v1296_v17 }
 0x67d   : > { %v1299_v19 = vsub.f32 %v1293_v13, %v1298_v18 }
 0x67f   : > { %v1300_v20 = vmul.f32 %v1299_v19, %v1299_v19 }
 0x681   : > { %v1301_v21 = vsel %vm585_vm1, %v1300_v20, 0.0 }
 0x682   : > { %1302 = vadd.xlane.f32.xlu1 %v1301_v21 }
 0x683   : > { %1988 = shalt.err (!%p1985_p10)
}
 0x684   : > { %s1989_s25 = scalar_lea.hbm %s2522_s4, 512  ;;  %s1993_s15 = scalar_lea.hbm %s2607_s13, 1024 }
 0x685   : > { %p1990_p3 = scmp.ne.s32.totalorder %s2522_s4, %s1989_s25  ;;  %p1994_p8 = scmp.lt.s32.totalorder %s2522_s4, %s2607_s13 }
 0x686   : > { %p1995_p13 = scmp.lt.s32.totalorder %s1993_s15, %s1989_s25 }
 0x687   : > { %p1991_p7 = pnand %p1990_p3, %p2648_p9 }
 0x688   : > { %p1996_p0 = por %p1995_p13, %p1994_p8 }
 0x689   : > { %p1992_p5 = pneg %p1991_p7 }
 0x68b   : > { %p1997_p2 = pnand %p1996_p0, %p1992_p5 }
 0x68d   : > { %2000 = shalt.err (!%p1997_p2)
}
 0x68e   : > { %s2104_s29 = smov 128   ;;  %v1563_v25 = vld [vmem:[%s2604_s10] ss:$0 sm:$0xff]  ;;  %s1567_s19 = sshll.u32 %s2197_s14, 7 }
 0x68f   : > { %1702 = dma.vmem_to_hbm [thread:$0]  (%p2648_p9), %s2524_s30, 512, %s2522_s4, %s1331_s6, %s2104_s29, %s2104_s29, %s2100_s17  }
 0x690   : > { %v1564_v27 = vld [vmem:[%s2605_s11] ss:$0 sm:$0xff]  ;;  %s551_s25 = scalar_lea.vmem [#allocation13], %s1531_s20  ;;  %s1342_s6 = scalar_lea.hbm %s2606_s12, %s1567_s19 }
 0x691   : > { %s1344_s17 = sshll.u32 %s551_s25, 4  ;;  %s1326_s2 = scalar_lea.sflag [#allocation4], %s2378_s0  ;;  %s1345_s17 = int_to_ptr.vmem [resolvable:$true] %s1344_s17 }
 0x692   : > { %s2001_s8 = scalar_lea.vmem %s1345_s17, 128  ;;  %s2105_s15 = smov [#allocation13]  }
 0x693   : > { %p2002_p11 = scmp.ne.s32.totalorder %s1345_s17, %s2001_s8  ;;  %s2005_s14 = sshll.u32 %s2105_s15, 4  ;;  %s2006_s14 = int_to_ptr.vmem [resolvable:$false] %s2005_s14 }
 0x694   : > { %s2007_s20 = scalar_lea.vmem %s2006_s14, 256  ;;  %p2008_p4 = scmp.lt.s32.totalorder %s1345_s17, %s2006_s14 }
 0x695   : > { %p2003_p12 = pnand %p2002_p11, %p2648_p9  ;;  %p2009_p6 = scmp.lt.s32.totalorder %s2007_s20, %s2001_s8 }
 0x697   : > { %p2004_p1 = pneg %p2003_p12  ;;  %p2010_p10 = por %p2009_p6, %p2008_p4 }
 0x699   : > { %p2011_p3 = pnand %p2010_p10, %p2004_p1 }
 0x70b   : > { %v1303_v5 = vpop.xlane.xlu1 %1302 }
 0x70c   : > { %v1304_v22 = vmul.f32 0.03125, %v1303_v5 }
 0x70e   : > { %v1305_v23 = vadd.f32 1e-12, %v1304_v22 }
 0x710   : > { %1813 = vrsqrt.f32 %v1305_v23 }
 0x71d   : > { %v1814_v24 = vpop.eup %1813 }
 0x71e   : > { %v1307_v26 = vmul.f32 %v1814_v24, %v1299_v19 }
 0x720   : > { %v1315_v28 = vmul.f32 %v1563_v25, %v1307_v26 }
 0x722   : > { %v1323_v29 = vadd.f32 %v1564_v27, %v1315_v28 }
 0x724   : > { %1324 = vst.msk [vmem:[%s551_s25] sm:$0xff] %vm585_vm1, %v1323_v29 }
 0x725   : > { %2014 = shalt.err (!%p2011_p3)
}
 0x726   : > { %s2015_s24 = scalar_lea.hbm %s1342_s6, 128  ;;  %s2019_s29 = scalar_lea.hbm %s2606_s12, 256 }
 0x727   : > { %p2016_p7 = scmp.ne.s32.totalorder %s1342_s6, %s2015_s24  ;;  %p2020_p13 = scmp.lt.s32.totalorder %s1342_s6, %s2606_s12 }
 0x728   : > { %p2021_p0 = scmp.lt.s32.totalorder %s2019_s29, %s2015_s24 }
 0x729   : > { %p2017_p5 = pnand %p2016_p7, %p2648_p9 }
 0x72a   : > { %p2022_p2 = por %p2021_p0, %p2020_p13 }
 0x72b   : > { %p2018_p8 = pneg %p2017_p5 }
 0x72d   : > { %p2023_p11 = pnand %p2022_p2, %p2018_p8 }
 0x72f   : > { %2026 = shalt.err (!%p2023_p11)
}
 0x730   : > { %1701 = dma.vmem_to_hbm [thread:$0]  (%p2648_p9), %s1345_s17, 128, %s1342_s6, %s1326_s2  }
 0x731 PF: > { %s2649_s23 = sld [smem:[#allocation23_spill]]  ;;  %p2652_p1 = scmp.ge.s32.totalorder %s2085_s28, 2 }
 0x732   : > { %s2650_s21 = sld [smem:[#allocation27_spill]] }
 0x737   : > { %s1372_s19 = sand.u32 1, %s2649_s23  }
 0x738   : > { %p2651_p12 = scmp.ne.s32.totalorder %s2650_s21, 0  ;;  %s1373_s25 = scalar_lea.sflag [#allocation4], %s1372_s19 }
 0x73a   : > { %p1726_p4 = pnand %p2652_p1, %p2651_p12 }
 0x73c   : > { %p1727_p6 = pneg %p1726_p4 }
 0x73e   : > { %2064 = dma.done.wait (%p1727_p6), %s1373_s25, 128  }
 0x73f   : > { %2066 = vsyncadd (%p1727_p6), %s1373_s25, 4294967168  ;;  %s1382_s30 = scalar_lea.sflag [#allocation15], %s1372_s19 }
 0x740   : > { %2068 = dma.done.wait (%p1727_p6), %s1382_s30, 512  }
 0x741   : > { %2070 = vsyncadd (%p1727_p6), %s1382_s30, 4294966784  ;;  %s2653_s28 = sld [smem:[#allocation25_spill]]  ;;  %s2656_s25 = smov %s2077_s26 }
 0x742   : > { %s2654_s4 = sld [smem:[#allocation24_spill]] }
 0x743   : > { %s2655_s27 = sld [smem:[#allocation26_spill]] }
 0x747   : > { %p35_p9 = scmp.ge.s32.totalorder %s2653_s28, 4  }
 0x748   : > { %s2657_s26 = smov %s2654_s4 }
 0x749   :  { %37 = sbr.rel (!%p35_p9) target bundleno = 17 (0x11), region = 159 }
 0x74e   :  { %1387 = vsyncpa [#allocation3], 1 }
 0x74f   :  { %1389 = vsyncpa [#allocation3 + $0x1], 1 }
 0x750   :  { %1390 = vsyncpa [#allocation6], 1 }
 0x751   :  { %1392 = vsyncpa [#allocation6 + $0x1], 1 }
 0x752   :  { %1393 = vsyncpa [#allocation9], 1 }
 0x753   :  { %1394 = vsyncpa [#allocation12], 1 }
 0x754   :  { %1395 = vsyncpa [#allocation4], 1 }
 0x755   :  { %1397 = vsyncpa [#allocation4 + $0x1], 1 }
 0x756   :  { %1398 = vsyncpa [#allocation15], 1 }
 0x757   :  { %1400 = vsyncpa [#allocation15 + $0x1], 1 }

</bundles_post_ra>
